<compile_context>
chip_gen: v5e
topology: v5e:2x2
jax: 0.10.0
libtpu: 0.0.40
codegen_flags: <defaults>
</compile_context>

<pallas_src>
import functools

import jax
import jax.numpy as jnp
from jax.experimental import pallas as pl
from jax.experimental.pallas import tpu as pltpu

_LANE = 128
_NEG_BIG = -1e30  # "minus infinity" without actual inf arithmetic


def _round_up(n, m):
    return ((n + m - 1) // m) * m


def _slab_layout(in_dim, mid_dim, out_dim):
    """Row offsets of w1 / b1 / w2 / b2 inside the packed parameter slab."""
    mid_pad = _round_up(max(mid_dim, _LANE), _LANE)
    out_pad = _round_up(max(out_dim, _LANE), _LANE)
    width = max(mid_pad, out_pad)
    r1 = _round_up(in_dim, 8)      # b1 row (w1 occupies rows [0, in_dim))
    r2 = r1 + 8                    # w2 rows [r2, r2 + mid_pad)
    r3 = r2 + mid_pad              # b2 row
    rows = r3 + 8
    return mid_pad, out_pad, width, r1, r2, r3, rows


def _mask_agent_kernel(out_dim, mid_pad, out_pad, r1, r2, r3,
                       x_ref, slab_ref, gumbel_ref, probs_ref, rate_ref):
    # x: (B, r1) zero-padded input        slab: packed params (rows, width)
    # gumbel: (B, out_pad) noise          probs: (B, out_dim)   rate: (B, 1)
    x = x_ref[...]

    # Linear 1 + ReLU.  Padded x columns / padded w1 rows are exact zeros.
    h = jnp.dot(x, slab_ref[0:r1, :mid_pad], preferred_element_type=jnp.float32)
    h = h + slab_ref[r1:r1 + 1, :mid_pad]
    h = jnp.maximum(h, 0.0)

    # Linear 2 -> logits over the lane-padded classes.
    logits = jnp.dot(h, slab_ref[r2:r2 + mid_pad, :out_pad],
                     preferred_element_type=jnp.float32)
    logits = logits + slab_ref[r3:r3 + 1, :out_pad]

    # Mask padded lanes so they get zero probability and are never sampled.
    lane = jax.lax.broadcasted_iota(jnp.int32, logits.shape, 1)
    valid = lane < out_dim
    logits = jnp.where(valid, logits, jnp.float32(_NEG_BIG))

    # Numerically stable softmax (exact division so the distribution sums to 1).
    m = jnp.max(logits, axis=-1, keepdims=True)
    e = jnp.exp(logits - m)
    denom = jnp.sum(e, axis=-1, keepdims=True)
    probs = e / denom
    probs_ref[...] = probs[:, :out_dim]

    # Fused categorical sample via Gumbel-max on the logits (same distribution
    # as Categorical(softmax(logits))).  Padded lanes stay at ~-1e30.
    y = logits + gumbel_ref[...]
    best = jnp.max(y, axis=-1, keepdims=True)                 # (B, 1)
    lane_f = lane.astype(jnp.float32)
    sentinel = jnp.float32(out_pad)                           # > any valid lane
    idx_f = jnp.min(jnp.where(y == best, lane_f, sentinel),
                    axis=-1, keepdims=True)                   # first argmax
    rate_ref[...] = idx_f * jnp.float32(0.1)                  # mask_rate = 0.1*idx


@functools.partial(jax.jit, static_argnames=("in_dim", "mid_dim", "out_dim"))
def mask_agent_forward(x, slab, key, *, in_dim, mid_dim, out_dim):
    """Full MaskAgent.forward: returns (mask_rate, probs) like the nn.Module."""
    B = x.shape[0]
    mid_pad, out_pad, _, r1, r2, r3, _ = _slab_layout(in_dim, mid_dim, out_dim)

    if x.shape[1] != r1:  # static no-op when in_dim is already 8-aligned
        x = jnp.pad(x, ((0, 0), (0, r1 - x.shape[1])))

    # Gumbel noise for the categorical sample (generated here because the
    # in-kernel hardware PRNG has no interpret-mode lowering).
    gumbel = jax.random.gumbel(key, (B, out_pad), dtype=jnp.float32)

    kernel = functools.partial(_mask_agent_kernel,
                               out_dim, mid_pad, out_pad, r1, r2, r3)
    probs, rate = pl.pallas_call(
        kernel,
        out_shape=(
            jax.ShapeDtypeStruct((B, out_dim), jnp.float32),  # probs
            jax.ShapeDtypeStruct((B, 1), jnp.float32),        # mask_rate per row
        ),
        in_specs=[
            pl.BlockSpec(memory_space=pltpu.MemorySpace.VMEM),  # x
            pl.BlockSpec(memory_space=pltpu.MemorySpace.VMEM),  # packed params
            pl.BlockSpec(memory_space=pltpu.MemorySpace.VMEM),  # gumbel noise
        ],
        out_specs=(
            pl.BlockSpec(memory_space=pltpu.MemorySpace.VMEM),
            pl.BlockSpec(memory_space=pltpu.MemorySpace.VMEM),
        ),
    )(x, slab, gumbel)

    # PyTorch's .item() implies a single sample (B == 1).
    mask_rate = rate[0, 0]
    return mask_rate, probs


def init_params(key, in_dim, mid_dim, out_dim):
    """Deterministic parameter init (mimics nn.Linear's uniform fan-in init)."""
    k1, k2, k3, k4 = jax.random.split(key, 4)
    bound1 = 1.0 / jnp.sqrt(in_dim)
    bound2 = 1.0 / jnp.sqrt(mid_dim)
    w1 = jax.random.uniform(k1, (in_dim, mid_dim), jnp.float32, -bound1, bound1)
    b1 = jax.random.uniform(k2, (mid_dim,), jnp.float32, -bound1, bound1)
    w2 = jax.random.uniform(k3, (mid_dim, out_dim), jnp.float32, -bound2, bound2)
    b2 = jax.random.uniform(k4, (out_dim,), jnp.float32, -bound2, bound2)
    return w1, b1, w2, b2


def pack_params(params, in_dim, mid_dim, out_dim):
    """One-time pack of w1/b1/w2/b2 into a single lane-aligned (rows, 128) slab."""
    w1, b1, w2, b2 = params
    _, _, width, r1, r2, r3, rows = _slab_layout(in_dim, mid_dim, out_dim)
    slab = jnp.zeros((rows, width), jnp.float32)
    slab = slab.at[:in_dim, :mid_dim].set(w1)
    slab = slab.at[r1, :mid_dim].set(b1)
    slab = slab.at[r2:r2 + mid_dim, :out_dim].set(w2)
    slab = slab.at[r3, :out_dim].set(b2)
    return slab


if __name__ == "__main__":
    in_dim, mid_dim, out_dim = 32, 32, 10  # out_dim=10 matches the 10 mask rates
    B = 1                                  # .item() in sample_matrix implies one sample

    key = jax.random.PRNGKey(0)
    kx, kp, ks = jax.random.split(key, 3)

    x = jax.random.normal(kx, (B, in_dim), dtype=jnp.float32)
    params = init_params(kp, in_dim, mid_dim, out_dim)
    slab = pack_params(params, in_dim, mid_dim, out_dim)

    mask_rate, probs = mask_agent_forward(
        x, slab, ks, in_dim=in_dim, mid_dim=mid_dim, out_dim=out_dim)
    mask_rate, probs = jax.block_until_ready((mask_rate, probs))

    # sanity: probs is a valid distribution over the real classes
    assert probs.shape == (B, out_dim)
    assert jnp.allclose(jnp.sum(probs, axis=-1), 1.0, atol=1e-5)

    # cross-check kernel math against a pure-JAX reference (unpadded params)
    w1, b1, w2, b2 = params
    h_ref = jnp.maximum(
        jnp.dot(x, w1, precision=jax.lax.Precision.HIGHEST) + b1, 0.0)
    logits_ref = jnp.dot(h_ref, w2, precision=jax.lax.Precision.HIGHEST) + b2
    probs_ref = jax.nn.softmax(logits_ref, axis=-1)
    assert jnp.allclose(probs, probs_ref, atol=1e-4)

    # mask_rate must be one of {0.0, 0.1, ..., 0.9}
    mr = float(mask_rate)
    idx = int(round(mr * 10.0))
    assert 0 <= idx < out_dim
    assert abs(mr - 0.1 * idx) < 1e-6

    print("KERNEL_OK")
</pallas_src>

<mosaic_0001>
module attributes {stable_mosaic.version = 11 : i64} {
  func.func @_mask_agent_kernel(%arg0: memref<1x32xf32, #tpu.memory_space<vmem>>, %arg1: memref<176x128xf32, #tpu.memory_space<vmem>>, %arg2: memref<1x128xf32, #tpu.memory_space<vmem>>, %arg3: memref<1x10xf32, #tpu.memory_space<vmem>>, %arg4: memref<1x1xf32, #tpu.memory_space<vmem>>) attributes {dimension_semantics = [], scalar_prefetch = 0 : i64, scratch_operands = 0 : i64, tpu.core_type = #tpu.core_type<tc>} {
    %c0 = arith.constant 0 : index
    %c0_0 = arith.constant 0 : index
    %0 = vector.load %arg0[%c0, %c0_0] : memref<1x32xf32, #tpu.memory_space<vmem>>, vector<1x32xf32>
    %c0_1 = arith.constant 0 : index
    %c0_2 = arith.constant 0 : index
    %1 = vector.load %arg1[%c0_1, %c0_2] : memref<176x128xf32, #tpu.memory_space<vmem>>, vector<32x128xf32>
    %cst = arith.constant dense<0.000000e+00> : vector<1x128xf32>
    %2 = tpu.matmul %0, %1, %cst {dimension_numbers = #tpu.dot_dimension_numbers<[1], [0], [0], [1], [0, 0, 1, 1], [], []>} : vector<1x32xf32>, vector<32x128xf32>, vector<1x128xf32> -> vector<1x128xf32>
    %c32 = arith.constant 32 : index
    %c0_3 = arith.constant 0 : index
    %3 = vector.load %arg1[%c32, %c0_3] : memref<176x128xf32, #tpu.memory_space<vmem>>, vector<1x128xf32>
    %4 = arith.addf %2, %3 : vector<1x128xf32>
    %cst_4 = arith.constant 0.000000e+00 : f32
    %5 = vector.broadcast %cst_4 : f32 to vector<1x128xf32>
    %6 = arith.maximumf %4, %5 : vector<1x128xf32>
    %c40 = arith.constant 40 : index
    %c0_5 = arith.constant 0 : index
    %7 = vector.load %arg1[%c40, %c0_5] : memref<176x128xf32, #tpu.memory_space<vmem>>, vector<128x128xf32>
    %cst_6 = arith.constant dense<0.000000e+00> : vector<1x128xf32>
    %8 = tpu.matmul %6, %7, %cst_6 {dimension_numbers = #tpu.dot_dimension_numbers<[1], [0], [0], [1], [0, 0, 1, 1], [], []>} : vector<1x128xf32>, vector<128x128xf32>, vector<1x128xf32> -> vector<1x128xf32>
    %c168 = arith.constant 168 : index
    %c0_7 = arith.constant 0 : index
    %9 = vector.load %arg1[%c168, %c0_7] : memref<176x128xf32, #tpu.memory_space<vmem>>, vector<1x128xf32>
    %10 = arith.addf %8, %9 : vector<1x128xf32>
    %11 = tpu.iota {dimensions = array<i32: 1>} : vector<1x128xi32>
    %c10_i32 = arith.constant 10 : i32
    %12 = vector.broadcast %c10_i32 : i32 to vector<1x128xi32>
    %13 = arith.cmpi slt, %11, %12 : vector<1x128xi32>
    %cst_8 = arith.constant -1.000000e+30 : f32
    %14 = vector.broadcast %cst_8 : f32 to vector<1x128xf32>
    %15 = arith.select %13, %10, %14 : vector<1x128xi1>, vector<1x128xf32>
    %cst_9 = arith.constant dense<0xFF800000> : vector<1xf32>
    %16 = vector.multi_reduction <maximumf>, %15, %cst_9 [1] : vector<1x128xf32> to vector<1xf32>
    %17 = vector.shape_cast %16 : vector<1xf32> to vector<1x1xf32>
    %18 = vector.broadcast %17 : vector<1x1xf32> to vector<1x128xf32>
    %19 = arith.subf %15, %18 : vector<1x128xf32>
    %20 = math.exp %19 : vector<1x128xf32>
    %cst_10 = arith.constant dense<0.000000e+00> : vector<1xf32>
    %21 = vector.multi_reduction <add>, %20, %cst_10 [1] : vector<1x128xf32> to vector<1xf32>
    %22 = vector.shape_cast %21 : vector<1xf32> to vector<1x1xf32>
    %23 = vector.broadcast %22 : vector<1x1xf32> to vector<1x128xf32>
    %24 = arith.divf %20, %23 : vector<1x128xf32>
    %25 = vector.extract_strided_slice %24 {offsets = [0, 0], sizes = [1, 10], strides = [1, 1]} : vector<1x128xf32> to vector<1x10xf32>
    %c0_11 = arith.constant 0 : index
    %c0_12 = arith.constant 0 : index
    %26 = vector.load %arg3[%c0_11, %c0_12] : memref<1x10xf32, #tpu.memory_space<vmem>>, vector<1x10xf32>
    tpu.vector_store %arg3[%c0_11, %c0_12], %25 {strides = array<i32>} : memref<1x10xf32, #tpu.memory_space<vmem>>, vector<1x10xf32>,
    %c0_13 = arith.constant 0 : index
    %c0_14 = arith.constant 0 : index
    %27 = vector.load %arg2[%c0_13, %c0_14] : memref<1x128xf32, #tpu.memory_space<vmem>>, vector<1x128xf32>
    %28 = arith.addf %15, %27 : vector<1x128xf32>
    %cst_15 = arith.constant dense<0xFF800000> : vector<1xf32>
    %29 = vector.multi_reduction <maximumf>, %28, %cst_15 [1] : vector<1x128xf32> to vector<1xf32>
    %30 = vector.shape_cast %29 : vector<1xf32> to vector<1x1xf32>
    %31 = arith.sitofp %11 : vector<1x128xi32> to vector<1x128xf32>
    %32 = vector.broadcast %30 : vector<1x1xf32> to vector<1x128xf32>
    %33 = arith.cmpf oeq, %28, %32 : vector<1x128xf32>
    %cst_16 = arith.constant 1.280000e+02 : f32
    %34 = vector.broadcast %cst_16 : f32 to vector<1x128xf32>
    %35 = arith.select %33, %31, %34 : vector<1x128xi1>, vector<1x128xf32>
    %cst_17 = arith.constant dense<0x7F800000> : vector<1xf32>
    %36 = vector.multi_reduction <minimumf>, %35, %cst_17 [1] : vector<1x128xf32> to vector<1xf32>
    %37 = vector.shape_cast %36 : vector<1xf32> to vector<1x1xf32>
    %cst_18 = arith.constant 1.000000e-01 : f32
    %38 = vector.broadcast %cst_18 : f32 to vector<1x1xf32>
    %39 = arith.mulf %37, %38 : vector<1x1xf32>
    %c0_19 = arith.constant 0 : index
    %c0_20 = arith.constant 0 : index
    %40 = vector.load %arg4[%c0_19, %c0_20] : memref<1x1xf32, #tpu.memory_space<vmem>>, vector<1x1xf32>
    tpu.vector_store %arg4[%c0_19, %c0_20], %39 {strides = array<i32>} : memref<1x1xf32, #tpu.memory_space<vmem>>, vector<1x1xf32>,
    return
  }
}

</mosaic_0001>

<bundles_post_ra>
// kernel: mask_agent_forward.1
= control target key start
LH: loop header
LB: loop body
LE: loop exit
PB: predicated region body
PF: predicated region fallthrough
CT: control target
= control target key end

     0   :  { %10 = vsyncpa [#allocation3], 0  ;;  %s317_s0 = inlined_call_operand.vmem [shape: f32[1,32], index: 0, kind: input, shape index: {}]   ;;  %s318_s1 = inlined_call_operand.hbm [shape: f32[176,128], index: 1, kind: input, shape index: {}]   ;;  %s319_s2 = inlined_call_operand.vmem [shape: f32[1,128], index: 2, kind: input, shape index: {}]   ;;  %s320_s3 = inlined_call_operand.hbm [shape: f32[1,10], index: 3, kind: output, shape index: {0}]   ;;  %s321_s4 = inlined_call_operand.hbm [shape: f32[1,1], index: 4, kind: output, shape index: {1}]  }
   0x1   :  { %11 = vsyncpa [#allocation4], 0 }
   0x2   :  { %12 = vsyncpa [#allocation7], 0  ;;  %s19_s17 = sshll.u32 %s318_s1, 4  ;;  %s268_s18 = smov [#allocation2]   ;;  %s20_s17 = int_to_ptr.hbm [resolvable:$true] %s19_s17 }
   0x3   :  { %s21_s19 = sshll.u32 %s268_s18, 4  ;;  %s269_s20 = smov 128   ;;  %s22_s19 = int_to_ptr.vmem [resolvable:$true] %s21_s19 }
   0x4   :  { %s270_s21 = smov 8  }
   0x5   :  { %27 = dma.hbm_to_vmem [thread:$0]  %s20_s17, 2816, %s22_s19, [#allocation3], %s269_s20, %s269_s20, %s270_s21  }
   0x6   :  { %262 = dma.done.wait [#allocation3], 2816  }
   0x7   :  { %263 = vsyncadd [#allocation3], 4294964480  ;;  %v38_v0 = vld [vmem:[#allocation2 + $0x18] sm:$0xff]  ;;  %v37_v1 = vld [vmem:[#allocation2 + $0x10] sm:$0xff]  ;;  %vm40_vm0 = vcmask 261120   ;;  %v102_v25 = vlaneseq  ;;  %vm106_vm2 = vcmask 1040384  }
   0x8   :  { %56 = vmatpush.msra.mxu0 %v38_v0  ;;  %v80_v2 = vld [vmem:[#allocation2 + $0xa0] sm:$0xff]  ;;  %v36_v3 = vld [vmem:[#allocation2 + $0x8] sm:$0xff]  ;;  %v79_v4 = vld [vmem:[#allocation2 + $0x98] sm:$0xff]  ;;  %s165_s27 = sshll.u32 %s321_s4, 4  ;;  %vm145_vm4 = vcmask 0   ;;  %s272_s28 = smov [#allocation5]   ;;  %s166_s27 = int_to_ptr.hbm [resolvable:$true] %s165_s27 }
   0x9   :  { %82 = vmatpush.msra.mxu1 %v80_v2  ;;  %v78_v5 = vld [vmem:[#allocation2 + $0x90] sm:$0xff]  ;;  %v35_v6 = vld [vmem:[#allocation2] sm:$0xff]  ;;  %v77_v8 = vld [vmem:[#allocation2 + $0x88] sm:$0xff]  ;;  %v103_v26 = vand.u32 127, %v102_v25  ;;  %s152_s4 = sshll.u32 %s272_s28, 4  ;;  %s154_s5 = sshll.u32 %s320_s3, 4  ;;  %s153_s4 = int_to_ptr.vmem [resolvable:$true] %s152_s4  ;;  %s155_s5 = int_to_ptr.hbm [resolvable:$true] %s154_s5 }
   0xa   :  { %57 = vmatpush.msra.mxu0 %v37_v1  ;;  %v34_v7 = vld [vmem:[%s317_s0] sm:$0x1]  ;;  %v75_v10 = vld [vmem:[#allocation2 + $0x78] sm:$0xff]  ;;  %v74_v11 = vld [vmem:[#allocation2 + $0x70] sm:$0xff]  ;;  %vm131_vm9 = vcmask 73728  }
   0xb   :  { %83 = vmatpush.msra.mxu1 %v79_v4  ;;  %v76_v9 = vld [vmem:[#allocation2 + $0x80] sm:$0xff]  ;;  %v73_v12 = vld [vmem:[#allocation2 + $0x68] sm:$0xff]  ;;  %v71_v14 = vld [vmem:[#allocation2 + $0x58] sm:$0xff]  ;;  %vm104_vm1 = vcmp.lt.s32.totalorder %v103_v26, 10  ;;  %v138_v41 = vcvt.s32.f32 %v103_v26 }
   0xc   :  { %58 = vmatpush.msra.mxu0 %v36_v3  ;;  %v72_v13 = vld [vmem:[#allocation2 + $0x60] sm:$0xff]  ;;  %v70_v15 = vld [vmem:[#allocation2 + $0x50] sm:$0xff]  ;;  %v69_v16 = vld [vmem:[#allocation2 + $0x48] sm:$0xff] }
   0xd   :  { %84 = vmatpush.msra.mxu1 %v78_v5  ;;  %v68_v17 = vld [vmem:[#allocation2 + $0x40] sm:$0xff]  ;;  %v67_v18 = vld [vmem:[#allocation2 + $0x38] sm:$0xff]  ;;  %v66_v19 = vld [vmem:[#allocation2 + $0x30] sm:$0xff] }
   0xe   :  { %59 = vmatpush.msra.mxu0 %v35_v6  ;;  %v65_v20 = vld [vmem:[#allocation2 + $0x28] sm:$0xff]  ;;  %v39_v21 = vld [vmem:[#allocation2 + $0x20] sm:$0x1] }
   0xf   :  { %180 = vmatmul.msk.f32.vlgmr.msra.gmra.mxu0 %vm40_vm0, %v34_v7  ;;  %85 = vmatpush.msra.mxu1 %v77_v8  ;;  %v81_v27 = vld [vmem:[#allocation2 + $0xa8] sm:$0x1]  ;;  %v133_v32 = vld [vmem:[%s319_s2] sm:$0x1]  ;;  %s271_s2 = smov [#allocation6]  }
  0x10   :  { %s163_s24 = sshll.u32 %s271_s2, 4  ;;  %s164_s24 = int_to_ptr.vmem [resolvable:$true] %s163_s24 }
  0x11   :  { %86 = vmatpush.msra.mxu1 %v76_v9 }
  0x13   :  { %87 = vmatpush.msra.mxu1 %v75_v10 }
  0x15   :  { %88 = vmatpush.msra.mxu1 %v74_v11 }
  0x17   :  { %89 = vmatpush.msra.mxu1 %v73_v12 }
  0x19   :  { %90 = vmatpush.msra.mxu1 %v72_v13 }
  0x1b   :  { %91 = vmatpush.msra.mxu1 %v71_v14 }
  0x1d   :  { %92 = vmatpush.msra.mxu1 %v70_v15 }
  0x1f   :  { %93 = vmatpush.msra.mxu1 %v69_v16 }
  0x21   :  { %94 = vmatpush.msra.mxu1 %v68_v17 }
  0x23   :  { %95 = vmatpush.msra.mxu1 %v67_v18 }
  0x25   :  { %96 = vmatpush.msra.mxu1 %v66_v19 }
  0x27   :  { %97 = vmatpush.msra.mxu1 %v65_v20 }
  0x8c   :  { %v61_v22 = vpop.f32.mrf.mxu0 }
  0x8d   :  { %v62_v23 = vadd.f32 %v61_v22, %v39_v21 }
  0x8f   :  { %v64_v24 = vmax.f32 %v62_v23, 0.0 }
  0x91   :  { %98 = vmatmul.f32.vlgmr.msra.gmra.mxu1 %v64_v24 }
 0x10e   :  { %v99_v28 = vpop.f32.mrf.mxu1 }
 0x10f   :  { %v100_v29 = vadd.f32 %v99_v28, %v81_v27 }
 0x111   :  { %v105_v30 = vsel %vm104_vm1, %v100_v29, -1e+30 }
 0x112   :  { %v107_v31 = vsel %vm106_vm2, %v105_v30, -inf  ;;  %v134_v33 = vadd.f32 %v133_v32, %v105_v30 }
 0x113   :  { %108 = vmax.xlane.f32.xlu0 %v107_v31 }
 0x114   :  { %v135_v34 = vsel %vm106_vm2, %v134_v33, -inf }
 0x11b   :  { %136 = vmax.xlane.f32.xlu0 %v135_v34 }
 0x186   :  { %v109_v35 = vpop.xlane.xlu0 %108 }
 0x187   :  { %v110_v36 = vsub.f32 %v105_v30, %v109_v35 }
 0x189   :  { %v111_v37 = vmul.f32 1.442695, %v110_v36 }
 0x18b   :  { %186 = vpow2.f32 %v111_v37 }
 0x18e   :  { %v137_v39 = vpop.xlane.xlu0 %136 }
 0x18f   :  { %vm139_vm3 = vcmp.eq.f32.partialorder %v134_v33, %v137_v39 }
 0x190   :  { %v140_v42 = vsel %vm139_vm3, %v138_v41, 128.0 }
 0x191   :  { %v187_v38 = vpop.eup %186  ;;  %v141_v43 = vsel %vm106_vm2, %v140_v42, inf }
 0x192   :  { %v113_v40 = vsel %vm106_vm2, %v187_v38, 0.0 }
 0x193   :  { %114 = vadd.xlane.f32.xlu1 %v113_v40 }
 0x19b   :  { %142 = vmin.xlane.f32.xlu1 %v141_v43 }
 0x206   :  { %v115_v44 = vpop.xlane.xlu1 %114 }
 0x207   :  { %188 = vrcp.f32 %v115_v44  ;;  %v127_v50 = vand.u32 2147483648, %v115_v44  ;;  %v125_v52 = vand.u32 2147483647, %v115_v44  ;;  %vm121_vm6 = vweird.f32 %v115_v44 }
 0x209   :  { %v128_v54 = vor.u32 1.1754944e-38, %v127_v50  ;;  %vm126_vm8 = vcmp.eq.f32.partialorder %v125_v52, 8.507059e+37 }
 0x20d   :  { %v189_v45 = vpop.eup %188 }
 0x20e   :  { %v117_v46 = vmul.f32 %v189_v45, %v115_v44  ;;  %v143_v47 = vpop.xlane.xlu1 %142  ;;  %vm122_vm5 = vweird.f32 %v189_v45 }
 0x20f   :  { %v144_v48 = vmul.f32 0.1, %v143_v47  ;;  %vm123_vm7 = vmor %vm121_vm6, %vm122_vm5 }
 0x210   :  { %v118_v49 = vsub.f32 1.0, %v117_v46 }
 0x211   :  { %146 = vst.msk [vmem:[#allocation6] sm:$0x1] %vm145_vm4, %v144_v48 }
 0x212   :  { %v119_v51 = vmul.f32 %v189_v45, %v118_v49  ;;  %168 = dma.vmem_to_hbm [thread:$0]  %s164_s24, 16, %s166_s27, [#allocation7]  }
 0x214   :  { %v120_v53 = vadd.f32 %v189_v45, %v119_v51 }
 0x216   :  { %v124_v55 = vsel %vm123_vm7, %v189_v45, %v120_v53 }
 0x217   :  { %v129_v56 = vsel %vm126_vm8, %v128_v54, %v124_v55 }
 0x218   :  { %v130_v57 = vmul.f32 %v187_v38, %v129_v56 }
 0x21a   :  { %132 = vst.msk [vmem:[#allocation5] sm:$0x1] %vm131_vm9, %v130_v57 }
 0x21b   :  { %157 = dma.vmem_to_hbm [thread:$0]  %s153_s4, 16, %s155_s5, [#allocation4]  }
 0x21c   :  { %264 = dma.done.wait [#allocation4], 16  }
 0x21d   :  { %265 = vsyncadd [#allocation4], 4294967280 }
 0x21e   :  { %266 = dma.done.wait [#allocation7], 16  }
 0x21f   :  { %267 = vsyncadd [#allocation7], 4294967280 }
 0x220   :  { %177 = vsyncpa [#allocation3], 1 }
 0x221   :  { %178 = vsyncpa [#allocation4], 1 }
 0x222   :  { %179 = vsyncpa [#allocation7], 1 }

</bundles_post_ra>
